<compile_context>
chip_gen: v5e
topology: v5e:2x2
jax: 0.10.0
libtpu: 0.0.40
codegen_flags: <defaults>
</compile_context>

<pallas_src>
import jax
import jax.numpy as jnp
from jax.experimental import pallas as pl
from jax.experimental.pallas import tpu as pltpu


def critic_kernel(xt_ref, w1_ref, b1_ref, w2_ref, b2_ref, w3_ref, b3_ref, o_ref):
    # Activations are (features, TILE_B): batch lives on the lane axis.
    xt = xt_ref[...].astype(jnp.bfloat16)                          # (D, TILE_B)

    # Layers 1-2: bf16 MXU matmuls with f32 accumulation; bias/ReLU in f32 (VPU).
    # Note: with small input_dims (e.g. 32) layer 1 only partially fills the MXU
    # contraction; zero-padding input_dims to 128 at init would recover ~5-10%
    # at large batch, but layer 1 is only ~11% of the FLOPs so we accept it.
    h1 = jnp.dot(w1_ref[...], xt, preferred_element_type=jnp.float32) + b1_ref[...]
    h1 = jnp.maximum(h1, 0.0)                                      # (H1, TILE_B) f32
    h2 = jnp.dot(w2_ref[...], h1.astype(jnp.bfloat16),
                 preferred_element_type=jnp.float32) + b2_ref[...]
    h2 = jnp.maximum(h2, 0.0)                                      # (H2, TILE_B) f32

    # Layer 3 (N=1): VPU multiply + cross-sublane reduction instead of an N=1
    # MXU matmul; the result is already lane-dense (1, TILE_B). b3 is an SMEM scalar.
    v = jnp.sum(h2 * w3_ref[...], axis=0, keepdims=True) + b3_ref[0]
    o_ref[...] = v.reshape(o_ref.shape).astype(o_ref.dtype)        # (1, 1, TILE_B)


def critic_forward(state, params, tile_b=512):
    """state: (B, input_dims) f32; params: PyTorch-native (out,in) weights, (out,) biases."""
    B, D = state.shape
    H1 = params["w1"].shape[0]
    H2 = params["w2"].shape[0]

    # Batch is the lane axis of the output tile -> keep TILE_B a multiple of 128.
    tile_b = min(tile_b, max(128, -(-B // 128) * 128))
    num_tiles = pl.cdiv(B, tile_b)
    Bp = num_tiles * tile_b

    # Layout plumbing (done once, outside the kernel): batch onto lanes + pad.
    xt = state.T                                                   # (D, B)
    if Bp != B:
        xt = jnp.pad(xt, ((0, 0), (0, Bp - B)))

    # One-time casts/reshapes. In a real PPO loop the weights would simply be
    # stored in bf16; they are VMEM-resident across all grid steps.
    w1 = params["w1"].astype(jnp.bfloat16)                         # (H1, D)
    w2 = params["w2"].astype(jnp.bfloat16)                         # (H2, H1)
    b1 = params["b1"].reshape(H1, 1).astype(jnp.float32)
    b2 = params["b2"].reshape(H2, 1).astype(jnp.float32)
    w3 = params["w3"].reshape(H2, 1).astype(jnp.float32)           # column for the reduction
    b3 = params["b3"].reshape(1).astype(jnp.float32)               # scalar -> SMEM

    out = pl.pallas_call(
        critic_kernel,
        out_shape=jax.ShapeDtypeStruct((num_tiles, 1, tile_b), jnp.float32),
        grid=(num_tiles,),
        in_specs=[
            pl.BlockSpec((D, tile_b), lambda i: (0, i)),           # activations: pipelined
            pl.BlockSpec((H1, D), lambda i: (0, 0)),               # weights/biases: resident
            pl.BlockSpec((H1, 1), lambda i: (0, 0)),
            pl.BlockSpec((H2, H1), lambda i: (0, 0)),
            pl.BlockSpec((H2, 1), lambda i: (0, 0)),
            pl.BlockSpec((H2, 1), lambda i: (0, 0)),
            pl.BlockSpec(memory_space=pltpu.MemorySpace.SMEM),     # b3 scalar
        ],
        out_specs=pl.BlockSpec((1, 1, tile_b), lambda i: (i, 0, 0)),
        compiler_params=pltpu.CompilerParams(
            dimension_semantics=("parallel",),   # shard batch tiles across TCs on v7x
            vmem_limit_bytes=32 * 1024 * 1024,   # explicit: safe on v5e/v6e/v7x
        ),
    )(xt, w1, b1, w2, b2, w3, b3)

    # (num_tiles, 1, tile_b) -> (B, 1), dropping batch padding.
    return out.reshape(Bp)[:B].reshape(B, 1)


def init_params(key, input_dims, fc1_dims=256, fc2_dims=256):
    """Deterministic PyTorch-style init; weights stored PyTorch-native (out, in)."""
    def linear(k, fan_in, fan_out):
        kw, kb = jax.random.split(k)
        bound = 1.0 / jnp.sqrt(jnp.float32(fan_in))
        w = jax.random.uniform(kw, (fan_out, fan_in), jnp.float32, -bound, bound)
        b = jax.random.uniform(kb, (fan_out,), jnp.float32, -bound, bound)
        return w, b

    k1, k2, k3 = jax.random.split(key, 3)
    w1, b1 = linear(k1, input_dims, fc1_dims)
    w2, b2 = linear(k2, fc1_dims, fc2_dims)
    w3, b3 = linear(k3, fc2_dims, 1)
    return {"w1": w1, "b1": b1, "w2": w2, "b2": b2, "w3": w3, "b3": b3}


def critic_reference(state, p):
    """Pure-f32 reference matching the PyTorch module semantics."""
    h1 = jnp.maximum(state @ p["w1"].T + p["b1"], 0.0)
    h2 = jnp.maximum(h1 @ p["w2"].T + p["b2"], 0.0)
    return h2 @ p["w3"].T + p["b3"]


# TODO(synk): optimizer (Adam) and checkpoint save/load are training/IO concerns,
# not part of the forward pass, so they are not implemented as kernels.

if __name__ == "__main__":
    key = jax.random.PRNGKey(0)
    k_params, k_state = jax.random.split(key)

    B, input_dims = 8, 32
    params = init_params(k_params, input_dims)
    state = jax.random.normal(k_state, (B, input_dims), jnp.float32)

    value = jax.block_until_ready(critic_forward(state, params))
    ref = critic_reference(state, params)

    assert value.shape == (B, 1)
    # bf16 MXU inputs (f32 accumulation) vs. pure-f32 reference -> loose tolerance.
    assert jnp.allclose(value, ref, atol=5e-2, rtol=5e-2), float(
        jnp.max(jnp.abs(value - ref)))

    print("KERNEL_OK")
</pallas_src>

<mosaic_0001>
module attributes {stable_mosaic.version = 11 : i64} {
  func.func @critic_kernel(%arg0: i32, %arg1: memref<32x128xf32, #tpu.memory_space<vmem>>, %arg2: memref<256x32xbf16, #tpu.memory_space<vmem>>, %arg3: memref<256x1xf32, #tpu.memory_space<vmem>>, %arg4: memref<256x256xbf16, #tpu.memory_space<vmem>>, %arg5: memref<256x1xf32, #tpu.memory_space<vmem>>, %arg6: memref<256x1xf32, #tpu.memory_space<vmem>>, %arg7: memref<1xf32, #tpu.memory_space<smem>>, %arg8: memref<1x1x128xf32, #tpu.memory_space<vmem>>) attributes {dimension_semantics = [#tpu.dimension_semantics<parallel>], iteration_bounds = array<i64: 1>, scalar_prefetch = 0 : i64, scratch_operands = 0 : i64, tpu.core_type = #tpu.core_type<tc>, window_params = [{transform_indices = @transform_0, window_bounds = array<i64: 32, 128>}, {pipeline_mode = #tpu.pipeline_mode<synchronous>, transform_indices = @transform_1, window_bounds = array<i64: 256, 32>}, {pipeline_mode = #tpu.pipeline_mode<synchronous>, transform_indices = @transform_2, window_bounds = array<i64: 256, 1>}, {pipeline_mode = #tpu.pipeline_mode<synchronous>, transform_indices = @transform_3, window_bounds = array<i64: 256, 256>}, {pipeline_mode = #tpu.pipeline_mode<synchronous>, transform_indices = @transform_4, window_bounds = array<i64: 256, 1>}, {pipeline_mode = #tpu.pipeline_mode<synchronous>, transform_indices = @transform_5, window_bounds = array<i64: 256, 1>}, {transform_indices = @transform_6, window_bounds = array<i64: 1>}, {transform_indices = @transform_7, window_bounds = array<i64: 1, 1, 128>}]} {
    %c0 = arith.constant 0 : index
    %c0_0 = arith.constant 0 : index
    %0 = vector.load %arg1[%c0, %c0_0] : memref<32x128xf32, #tpu.memory_space<vmem>>, vector<32x128xf32>
    %1 = arith.truncf %0 : vector<32x128xf32> to vector<32x128xbf16>
    %c0_1 = arith.constant 0 : index
    %c0_2 = arith.constant 0 : index
    %2 = vector.load %arg2[%c0_1, %c0_2] : memref<256x32xbf16, #tpu.memory_space<vmem>>, vector<256x32xbf16>
    %cst = arith.constant dense<0.000000e+00> : vector<256x128xf32>
    %3 = tpu.matmul %2, %1, %cst {dimension_numbers = #tpu.dot_dimension_numbers<[1], [0], [0], [1], [0, 0, 1, 1], [], []>} : vector<256x32xbf16>, vector<32x128xbf16>, vector<256x128xf32> -> vector<256x128xf32>
    %c0_3 = arith.constant 0 : index
    %c0_4 = arith.constant 0 : index
    %4 = vector.load %arg3[%c0_3, %c0_4] : memref<256x1xf32, #tpu.memory_space<vmem>>, vector<256x1xf32>
    %5 = vector.broadcast %4 : vector<256x1xf32> to vector<256x128xf32>
    %6 = arith.addf %3, %5 : vector<256x128xf32>
    %cst_5 = arith.constant 0.000000e+00 : f32
    %7 = vector.broadcast %cst_5 : f32 to vector<256x128xf32>
    %8 = arith.maximumf %6, %7 : vector<256x128xf32>
    %c0_6 = arith.constant 0 : index
    %c0_7 = arith.constant 0 : index
    %9 = vector.load %arg4[%c0_6, %c0_7] : memref<256x256xbf16, #tpu.memory_space<vmem>>, vector<256x256xbf16>
    %10 = arith.truncf %8 : vector<256x128xf32> to vector<256x128xbf16>
    %cst_8 = arith.constant dense<0.000000e+00> : vector<256x128xf32>
    %11 = tpu.matmul %9, %10, %cst_8 {dimension_numbers = #tpu.dot_dimension_numbers<[1], [0], [0], [1], [0, 0, 1, 1], [], []>} : vector<256x256xbf16>, vector<256x128xbf16>, vector<256x128xf32> -> vector<256x128xf32>
    %c0_9 = arith.constant 0 : index
    %c0_10 = arith.constant 0 : index
    %12 = vector.load %arg5[%c0_9, %c0_10] : memref<256x1xf32, #tpu.memory_space<vmem>>, vector<256x1xf32>
    %13 = vector.broadcast %12 : vector<256x1xf32> to vector<256x128xf32>
    %14 = arith.addf %11, %13 : vector<256x128xf32>
    %cst_11 = arith.constant 0.000000e+00 : f32
    %15 = vector.broadcast %cst_11 : f32 to vector<256x128xf32>
    %16 = arith.maximumf %14, %15 : vector<256x128xf32>
    %c0_12 = arith.constant 0 : index
    %c0_13 = arith.constant 0 : index
    %17 = vector.load %arg6[%c0_12, %c0_13] : memref<256x1xf32, #tpu.memory_space<vmem>>, vector<256x1xf32>
    %18 = vector.broadcast %17 : vector<256x1xf32> to vector<256x128xf32>
    %19 = arith.mulf %16, %18 : vector<256x128xf32>
    %cst_14 = arith.constant dense<0.000000e+00> : vector<128xf32>
    %20 = vector.multi_reduction <add>, %19, %cst_14 [0] : vector<256x128xf32> to vector<128xf32>
    %21 = vector.shape_cast %20 : vector<128xf32> to vector<1x128xf32>
    %c0_15 = arith.constant 0 : index
    %22 = memref.load %arg7[%c0_15] : memref<1xf32, #tpu.memory_space<smem>>
    %23 = vector.broadcast %22 : f32 to vector<1x128xf32>
    %24 = arith.addf %21, %23 : vector<1x128xf32>
    %25 = vector.shape_cast %24 : vector<1x128xf32> to vector<1x1x128xf32>
    %c0_16 = arith.constant 0 : index
    %c0_17 = arith.constant 0 : index
    %c0_18 = arith.constant 0 : index
    %26 = vector.load %arg8[%c0_16, %c0_17, %c0_18] : memref<1x1x128xf32, #tpu.memory_space<vmem>>, vector<1x1x128xf32>
    tpu.vector_store %arg8[%c0_16, %c0_17, %c0_18], %25 {strides = array<i32>} : memref<1x1x128xf32, #tpu.memory_space<vmem>>, vector<1x1x128xf32>,
    return
  }
  func.func @transform_0(%arg0: i32) -> (i32, i32) {
    %c0_i32 = arith.constant 0 : i32
    %c0_i32_0 = arith.constant 0 : i32
    return %c0_i32, %arg0 : i32, i32
  }
  func.func @transform_1(%arg0: i32) -> (i32, i32) {
    %c0_i32 = arith.constant 0 : i32
    %c0_i32_0 = arith.constant 0 : i32
    %c0_i32_1 = arith.constant 0 : i32
    return %c0_i32, %c0_i32_0 : i32, i32
  }
  func.func @transform_2(%arg0: i32) -> (i32, i32) {
    %c0_i32 = arith.constant 0 : i32
    %c0_i32_0 = arith.constant 0 : i32
    %c0_i32_1 = arith.constant 0 : i32
    return %c0_i32, %c0_i32_0 : i32, i32
  }
  func.func @transform_3(%arg0: i32) -> (i32, i32) {
    %c0_i32 = arith.constant 0 : i32
    %c0_i32_0 = arith.constant 0 : i32
    %c0_i32_1 = arith.constant 0 : i32
    return %c0_i32, %c0_i32_0 : i32, i32
  }
  func.func @transform_4(%arg0: i32) -> (i32, i32) {
    %c0_i32 = arith.constant 0 : i32
    %c0_i32_0 = arith.constant 0 : i32
    %c0_i32_1 = arith.constant 0 : i32
    return %c0_i32, %c0_i32_0 : i32, i32
  }
  func.func @transform_5(%arg0: i32) -> (i32, i32) {
    %c0_i32 = arith.constant 0 : i32
    %c0_i32_0 = arith.constant 0 : i32
    %c0_i32_1 = arith.constant 0 : i32
    return %c0_i32, %c0_i32_0 : i32, i32
  }
  func.func @transform_6(%arg0: i32) -> i32 {
    %c0_i32 = arith.constant 0 : i32
    %c0_i32_0 = arith.constant 0 : i32
    return %c0_i32 : i32
  }
  func.func @transform_7(%arg0: i32) -> (i32, i32, i32) {
    %c0_i32 = arith.constant 0 : i32
    %c0_i32_0 = arith.constant 0 : i32
    %c0_i32_1 = arith.constant 0 : i32
    return %arg0, %c0_i32, %c0_i32_0 : i32, i32, i32
  }
}

</mosaic_0001>

<bundles_post_ra>
// kernel: tpu_custom_call.1
= control target key start
LH: loop header
LB: loop body
LE: loop exit
PB: predicated region body
PF: predicated region fallthrough
CT: control target
= control target key end

     0   :  { %v1705_v3 = vmov 0   ;;  %s2552_s0 = inlined_call_operand.vmem [shape: f32[32,128], index: 0, kind: input, shape index: {}]   ;;  %s2553_s1 = inlined_call_operand.vmem [shape: bf16[256,32], index: 1, kind: input, shape index: {}]   ;;  %s2554_s2 = inlined_call_operand.vmem [shape: f32[256,1], index: 2, kind: input, shape index: {}]   ;;  %s2555_s3 = inlined_call_operand.vmem [shape: bf16[256,256], index: 3, kind: input, shape index: {}]   ;;  %s2556_s4 = inlined_call_operand.vmem [shape: f32[256,1], index: 4, kind: input, shape index: {}]   ;;  %s2557_s5 = inlined_call_operand.vmem [shape: f32[256,1], index: 5, kind: input, shape index: {}]   ;;  %s2558_s6 = inlined_call_operand.<no memory space> [shape: f32[1], index: 6, kind: input, shape index: {}]   ;;  %s2559_s7 = inlined_call_operand.hbm [shape: f32[1,1,128], index: 7, kind: output, shape index: {}]  }
   0x1   :  { %v71_v0 = vld [vmem:[%s2554_s2 + $0x20] sm:$0xff]  ;;  %v69_v1 = vld [vmem:[%s2554_s2 + $0x10] sm:$0xff]  ;;  %1678 = vset.pattern.permute.xlu2 %v1705_v3  ;;  %1677 = vset.pattern.permute.xlu1 %v1705_v3  ;;  %v32_v5 = vld [vmem:[%s2552_s0 + $0x18] sm:$0xff] }
   0x2   :  { %v67_v2 = vld [vmem:[%s2554_s2] sm:$0xff]  ;;  %v31_v4 = vld [vmem:[%s2552_s0 + $0x10] sm:$0xff]  ;;  %1676 = vset.pattern.permute.xlu0 %v1705_v3  ;;  %121 = vperm.xlu2 %1678, %v71_v0   ;;  %v30_v8 = vld [vmem:[%s2552_s0 + $0x8] sm:$0xff] }
   0x3   :  { %v29_v6 = vld [vmem:[%s2552_s0] sm:$0xff]  ;;  %v34_v7 = vpack.c.bf16 %v32_v5, %v31_v4  ;;  %111 = vperm.xlu1 %1677, %v69_v1   ;;  %101 = vperm.xlu0 %1676, %v67_v2   ;;  %v72_v10 = vld [vmem:[%s2554_s2 + $0x28] sm:$0xff] }
   0x4   :  { %v33_v9 = vpack.c.bf16 %v30_v8, %v29_v6 }
   0x5   :  { %394 = vmatpush.bf16.msra.mxu0 %v34_v7  ;;  %1656 = vmatpush.bf16.msra.mxu3 %v34_v7 }
   0x6   :  { %13 = vsyncpa [#allocation4], 0  ;;  %v70_v11 = vld [vmem:[%s2554_s2 + $0x18] sm:$0xff]  ;;  %v68_v12 = vld [vmem:[%s2554_s2 + $0x8] sm:$0xff]  ;;  %vm339_vm0 = vcmask 261120   ;;  %s1706_s21 = smov [#allocation3]  }
   0x7   :  { %v1608_v13 = vld [vmem:[%s2553_s1] sm:$0xff]  ;;  %v74_v15 = vld [vmem:[%s2554_s2 + $0x38] sm:$0xff]  ;;  %v73_v16 = vld [vmem:[%s2554_s2 + $0x30] sm:$0xff]  ;;  %s1389_s22 = sshll.u32 %s1706_s21, 4  ;;  %s1391_s24 = sshll.u32 %s2559_s7, 4  ;;  %s1390_s22 = int_to_ptr.vmem [resolvable:$true] %s1389_s22  ;;  %s1392_s24 = int_to_ptr.hbm [resolvable:$true] %s1391_s24 }
   0x8   :  { %v75_v14 = vld [vmem:[%s2554_s2 + $0x40] sm:$0xff]  ;;  %v78_v17 = vld [vmem:[%s2554_s2 + $0x58] sm:$0xff]  ;;  %v77_v18 = vld [vmem:[%s2554_s2 + $0x50] sm:$0xff] }
   0x9   :  { %395 = vmatpush.bf16.msra.mxu0 %v33_v9  ;;  %1657 = vmatpush.bf16.msra.mxu3 %v33_v9  ;;  %v76_v19 = vld [vmem:[%s2554_s2 + $0x48] sm:$0xff]  ;;  %v81_v21 = vld [vmem:[%s2554_s2 + $0x70] sm:$0xff]  ;;  %v79_v23 = vld [vmem:[%s2554_s2 + $0x60] sm:$0xff] }
   0xa   :  { %126 = vperm.xlu2 %1678, %v72_v10   ;;  %v1609_v20 = vld [vmem:[%s2553_s1 + $0x8] sm:$0xff]  ;;  %v83_v26 = vld [vmem:[%s2554_s2 + $0x80] sm:$0xff]  ;;  %v82_v27 = vld [vmem:[%s2554_s2 + $0x78] sm:$0xff] }
   0xb   :  { %116 = vperm.xlu1 %1677, %v70_v11   ;;  %106 = vperm.xlu0 %1676, %v68_v12   ;;  %v80_v22 = vld [vmem:[%s2554_s2 + $0x68] sm:$0xff]  ;;  %v1610_v28 = vld [vmem:[%s2553_s1 + $0x10] sm:$0xff]  ;;  %v87_v29 = vld [vmem:[%s2554_s2 + $0xa0] sm:$0xff] }
   0xc   :  { %1464 = vmatmul.msk.bf16.vlgmr.msra.gmra.mxu0 %vm339_vm0, %v1608_v13  ;;  %v1621_v24 = vld [vmem:[%s2553_s1 + $0x68] sm:$0xff]  ;;  %v86_v30 = vld [vmem:[%s2554_s2 + $0x98] sm:$0xff]  ;;  %v85_v31 = vld [vmem:[%s2554_s2 + $0x90] sm:$0xff] }
   0xd   :  { %1477 = vmatmul.msk.bf16.vlgmr.msra.gmra.mxu3 %vm339_vm0, %v1621_v24  ;;  %v84_v25 = vld [vmem:[%s2554_s2 + $0x88] sm:$0xff]  ;;  %v1622_v32 = vld [vmem:[%s2553_s1 + $0x70] sm:$0xff]  ;;  %v90_v33 = vld [vmem:[%s2554_s2 + $0xb8] sm:$0xff] }
   0xe   :  { %v89_v34 = vld [vmem:[%s2554_s2 + $0xb0] sm:$0xff]  ;;  %v88_v35 = vld [vmem:[%s2554_s2 + $0xa8] sm:$0xff]  ;;  %v1611_v36 = vld [vmem:[%s2553_s1 + $0x18] sm:$0xff] }
   0xf   :  { %v98_v37 = vld [vmem:[%s2554_s2 + $0xf8] sm:$0xff]  ;;  %v97_v38 = vld [vmem:[%s2554_s2 + $0xf0] sm:$0xff]  ;;  %v91_v39 = vld [vmem:[%s2554_s2 + $0xc0] sm:$0xff] }
  0x10   :  { %v1623_v40 = vld [vmem:[%s2553_s1 + $0x78] sm:$0xff]  ;;  %v93_v41 = vld [vmem:[%s2554_s2 + $0xd0] sm:$0xff]  ;;  %v96_v42 = vld [vmem:[%s2554_s2 + $0xe8] sm:$0xff] }
  0x11   :  { %v95_v43 = vld [vmem:[%s2554_s2 + $0xe0] sm:$0xff]  ;;  %v92_v46 = vld [vmem:[%s2554_s2 + $0xc8] sm:$0xff]  ;;  %v94_v47 = vld [vmem:[%s2554_s2 + $0xd8] sm:$0xff] }
  0x12   :  { %141 = vperm.xlu2 %1678, %v75_v14   ;;  %v1612_v44 = vld [vmem:[%s2553_s1 + $0x20] sm:$0xff]  ;;  %v560_v48 = vld [vmem:[%s2556_s4 + $0x18] sm:$0xff]  ;;  %v559_v49 = vld [vmem:[%s2556_s4 + $0x10] sm:$0xff] }
  0x13   :  { %136 = vperm.xlu1 %1677, %v74_v15   ;;  %131 = vperm.xlu0 %1676, %v73_v16   ;;  %v557_v45 = vld [vmem:[%s2556_s4] sm:$0xff]  ;;  %v558_v50 = vld [vmem:[%s2556_s4 + $0x8] sm:$0xff]  ;;  %v563_v52 = vld [vmem:[%s2556_s4 + $0x30] sm:$0xff] }
  0x14   :  { %v1613_v51 = vld [vmem:[%s2553_s1 + $0x28] sm:$0xff]  ;;  %v561_v54 = vld [vmem:[%s2556_s4 + $0x20] sm:$0xff]  ;;  %v564_v57 = vld [vmem:[%s2556_s4 + $0x38] sm:$0xff] }
  0x15   :  { %v562_v53 = vld [vmem:[%s2556_s4 + $0x28] sm:$0xff]  ;;  %v565_v56 = vld [vmem:[%s2556_s4 + $0x40] sm:$0xff]  ;;  %v1614_v58 = vld [vmem:[%s2553_s1 + $0x30] sm:$0xff] }
  0x16   :  { %v566_v55 = vld [vmem:[%s2556_s4 + $0x48] sm:$0xff]  ;;  %v569_v59 = vld [vmem:[%s2556_s4 + $0x60] sm:$0xff]  ;;  %v568_v60 = vld [vmem:[%s2556_s4 + $0x58] sm:$0xff] }
  0x17   :  { %v567_v61 = vld [vmem:[%s2556_s4 + $0x50] sm:$0xff]  ;;  %v572_v63 = vld [vmem:[%s2556_s4 + $0x78] sm:$0xff]  ;;  %v570_v1 = vld [vmem:[%s2556_s4 + $0x68] sm:$0xff] }
  0x18   :  { %v571_v0 = vld [vmem:[%s2556_s4 + $0x70] sm:$0xff]  ;;  %v1615_v2 = vld [vmem:[%s2553_s1 + $0x38] sm:$0xff]  ;;  %v574_v7 = vld [vmem:[%s2556_s4 + $0x88] sm:$0xff] }
  0x19   :  { %v575_v6 = vld [vmem:[%s2556_s4 + $0x90] sm:$0xff]  ;;  %v573_v8 = vld [vmem:[%s2556_s4 + $0x80] sm:$0xff]  ;;  %v578_v10 = vld [vmem:[%s2556_s4 + $0xa8] sm:$0xff] }
  0x1a   :  { %156 = vperm.xlu2 %1678, %v78_v17   ;;  %v577_v12 = vld [vmem:[%s2556_s4 + $0xa0] sm:$0xff]  ;;  %v576_v13 = vld [vmem:[%s2556_s4 + $0x98] sm:$0xff] }
  0x1b   :  { %151 = vperm.xlu1 %1677, %v77_v18   ;;  %146 = vperm.xlu0 %1676, %v76_v19   ;;  %v1616_v14 = vld [vmem:[%s2553_s1 + $0x40] sm:$0xff] }
  0x1c   :  { %1465 = vmatmul.msk.bf16.gmra.mxu0 %vm339_vm0, %v1609_v20  ;;  %v581_v19 = vld [vmem:[%s2556_s4 + $0xc0] sm:$0xff]  ;;  %v580_v20 = vld [vmem:[%s2556_s4 + $0xb8] sm:$0xff] }
  0x1d   :  { %1478 = vmatmul.msk.bf16.gmra.mxu3 %vm339_vm0, %v1622_v32  ;;  %v582_v32 = vld [vmem:[%s2556_s4 + $0xc8] sm:$0xff] }
  0x22   :  { %171 = vperm.xlu2 %1678, %v81_v21   ;;  %v579_v21 = vld [vmem:[%s2556_s4 + $0xb0] sm:$0xff] }
  0x23   :  { %166 = vperm.xlu1 %1677, %v80_v22   ;;  %161 = vperm.xlu0 %1676, %v79_v23  }
  0x2a   :  { %186 = vperm.xlu2 %1678, %v84_v25  }
  0x2b   :  { %181 = vperm.xlu1 %1677, %v83_v26   ;;  %176 = vperm.xlu0 %1676, %v82_v27  }
  0x2c   :  { %1466 = vmatmul.msk.bf16.gmra.mxu0 %vm339_vm0, %v1610_v28 }
  0x2d   :  { %1479 = vmatmul.msk.bf16.gmra.mxu3 %vm339_vm0, %v1623_v40  ;;  %v585_v40 = vld [vmem:[%s2556_s4 + $0xe0] sm:$0xff] }
  0x32   :  { %201 = vperm.xlu2 %1678, %v87_v29   ;;  %v584_v29 = vld [vmem:[%s2556_s4 + $0xd8] sm:$0xff] }
  0x33   :  { %196 = vperm.xlu1 %1677, %v86_v30   ;;  %191 = vperm.xlu0 %1676, %v85_v31   ;;  %v583_v31 = vld [vmem:[%s2556_s4 + $0xd0] sm:$0xff] }
  0x3a   :  { %216 = vperm.xlu2 %1678, %v90_v33   ;;  %v1617_v33 = vld [vmem:[%s2553_s1 + $0x48] sm:$0xff] }
  0x3b   :  { %211 = vperm.xlu1 %1677, %v89_v34   ;;  %206 = vperm.xlu0 %1676, %v88_v35  }
  0x3c   :  { %1467 = vmatmul.msk.bf16.gmra.mxu0 %vm339_vm0, %v1611_v36 }
  0x42   :  { %256 = vperm.xlu2 %1678, %v98_v37  }
  0x43   :  { %251 = vperm.xlu1 %1677, %v97_v38   ;;  %221 = vperm.xlu0 %1676, %v91_v39   ;;  %v587_v38 = vld [vmem:[%s2556_s4 + $0xf0] sm:$0xff]  ;;  %v586_v39 = vld [vmem:[%s2556_s4 + $0xe8] sm:$0xff] }
  0x4a   :  { %231 = vperm.xlu2 %1678, %v93_v41  }
  0x4b   :  { %246 = vperm.xlu1 %1677, %v96_v42   ;;  %241 = vperm.xlu0 %1676, %v95_v43  }
  0x4c   :  { %1468 = vmatmul.msk.bf16.gmra.mxu0 %vm339_vm0, %v1612_v44 }
  0x52   :  { %591 = vperm.xlu2 %1678, %v557_v45  }
  0x53   :  { %226 = vperm.xlu1 %1677, %v92_v46   ;;  %236 = vperm.xlu0 %1676, %v94_v47  }
  0x5a   :  { %606 = vperm.xlu2 %1678, %v560_v48  }
  0x5b   :  { %601 = vperm.xlu1 %1677, %v559_v49   ;;  %596 = vperm.xlu0 %1676, %v558_v50   ;;  %v1120_v49 = vld [vmem:[%s2557_s5 + $0x8] sm:$0xff]  ;;  %v1119_v50 = vld [vmem:[%s2557_s5] sm:$0xff] }
  0x5c   :  { %1469 = vmatmul.msk.bf16.gmra.mxu0 %vm339_vm0, %v1613_v51  ;;  %v1947_v4 = vpop.permute.xlu2 %121  ;;  %v588_v51 = vld [vmem:[%s2556_s4 + $0xf8] sm:$0xff] }
  0x62   :  { %621 = vperm.xlu2 %1678, %v563_v52   ;;  %v1618_v52 = vld [vmem:[%s2553_s1 + $0x50] sm:$0xff] }
  0x63   :  { %616 = vperm.xlu1 %1677, %v562_v53   ;;  %611 = vperm.xlu0 %1676, %v561_v54  }
  0x64   :  { %v1961_v11 = vpop.permute.xlu2 %126 }
  0x6a   :  { %636 = vperm.xlu2 %1678, %v566_v55  }
  0x6b   :  { %631 = vperm.xlu1 %1677, %v565_v56   ;;  %626 = vperm.xlu0 %1676, %v564_v57   ;;  %v1123_v56 = vld [vmem:[%s2557_s5 + $0x20] sm:$0xff] }
  0x6c   :  { %1470 = vmatmul.msk.bf16.gmra.mxu0 %vm339_vm0, %v1614_v58  ;;  %v1986_v23 = vpop.permute.xlu2 %141 }
  0x72   :  { %651 = vperm.xlu2 %1678, %v569_v59   ;;  %v1122_v59 = vld [vmem:[%s2557_s5 + $0x18] sm:$0xff] }
  0x73   :  { %646 = vperm.xlu1 %1677, %v568_v60   ;;  %641 = vperm.xlu0 %1676, %v567_v61   ;;  %v1121_v60 = vld [vmem:[%s2557_s5 + $0x10] sm:$0xff] }
  0x74   :  { %v2006_v36 = vpop.permute.xlu2 %156 }
  0x75   :  { %v102_v62 = vpop.permute.xlu0 %101  ;;  %v112_v3 = vpop.permute.xlu1 %111 }
  0x7a   :  { %666 = vperm.xlu2 %1678, %v572_v63  }
  0x7b   :  { %661 = vperm.xlu1 %1677, %v571_v0   ;;  %656 = vperm.xlu0 %1676, %v570_v1  }
  0x7c   :  { %1471 = vmatmul.msk.bf16.gmra.mxu0 %vm339_vm0, %v1615_v2  ;;  %v2022_v46 = vpop.permute.xlu2 %171 }
  0x7d   :  { %v107_v5 = vpop.permute.xlu0 %106  ;;  %v117_v9 = vpop.permute.xlu1 %116 }
  0x82   :  { %681 = vperm.xlu2 %1678, %v575_v6   ;;  %v1125_v6 = vld [vmem:[%s2557_s5 + $0x30] sm:$0xff] }
  0x83   :  { %676 = vperm.xlu1 %1677, %v574_v7   ;;  %671 = vperm.xlu0 %1676, %v573_v8   ;;  %v1124_v7 = vld [vmem:[%s2557_s5 + $0x28] sm:$0xff]  ;;  %v1619_v8 = vld [vmem:[%s2553_s1 + $0x58] sm:$0xff] }
  0x84   :  { %v2048_v57 = vpop.permute.xlu2 %186 }
  0x85   :  { %v1972_v15 = vpop.permute.xlu0 %131  ;;  %v1975_v18 = vpop.permute.xlu1 %136 }
  0x89   :  { %v397_v16 = vpop.f32.mrf.mxu0 }
  0x8a   :  { %v398_v17 = vadd.f32 %v397_v16, %v102_v62  ;;  %696 = vperm.xlu2 %1678, %v578_v10  }
  0x8b   :  { %691 = vperm.xlu1 %1677, %v577_v12   ;;  %686 = vperm.xlu0 %1676, %v576_v13  }
  0x8c   :  { %1472 = vmatmul.msk.bf16.gmra.mxu0 %vm339_vm0, %v1616_v14  ;;  %v477_v26 = vmax.f32 %v398_v17, 0.0  ;;  %v2078_v10 = vpop.permute.xlu2 %201  ;;  %v1129_v14 = vld [vmem:[%s2557_s5 + $0x50] sm:$0xff]  ;;  %v1128_v17 = vld [vmem:[%s2557_s5 + $0x48] sm:$0xff] }
  0x8d   :  { %v1988_v25 = vpop.permute.xlu0 %146  ;;  %v1995_v30 = vpop.permute.xlu1 %151 }
  0x90   :  { %v2043_v55 = vpop.f32.mrf.mxu3 }
  0x91   :  { %v399_v22 = vpop.f32.mrf.mxu0 }
  0x92   :  { %v400_v24 = vadd.f32 %v399_v22, %v107_v5  ;;  %711 = vperm.xlu2 %1678, %v581_v19   ;;  %v1126_v5 = vld [vmem:[%s2557_s5 + $0x38] sm:$0xff] }
  0x93   :  { %706 = vperm.xlu1 %1677, %v580_v20   ;;  %701 = vperm.xlu0 %1676, %v579_v21  }
  0x94   :  { %v478_v27 = vmax.f32 %v400_v24, 0.0  ;;  %v2096_v21 = vpop.permute.xlu2 %216 }
  0x95   :  { %v2009_v37 = vpop.permute.xlu0 %161  ;;  %v2020_v42 = vpop.permute.xlu1 %166 }
  0x96   :  { %v1990_v28 = vpack.c.bf16 %v478_v27, %v477_v26 }
  0x98   :  { %v2060_v2 = vpop.f32.mrf.mxu3 }
  0x99   :  { %v402_v34 = vpop.f32.mrf.mxu0 }
  0x9a   :  { %v403_v35 = vadd.f32 %v402_v34, %v112_v3  ;;  %726 = vperm.xlu2 %1678, %v584_v29  }
  0x9b   :  { %721 = vperm.xlu1 %1677, %v583_v31   ;;  %716 = vperm.xlu0 %1676, %v582_v32   ;;  %v1132_v31 = vld [vmem:[%s2557_s5 + $0x68] sm:$0xff]  ;;  %v1130_v32 = vld [vmem:[%s2557_s5 + $0x58] sm:$0xff] }
  0x9c   :  { %1473 = vmatmul.msk.bf16.gmra.mxu0 %vm339_vm0, %v1617_v33  ;;  %v479_v44 = vmax.f32 %v403_v35, 0.0  ;;  %v1620_v33 = vld [vmem:[%s2553_s1 + $0x60] sm:$0xff] }
  0x9d   :  { %v2026_v48 = vpop.permute.xlu0 %176  ;;  %v2040_v54 = vpop.permute.xlu1 %181 }
  0xa0   :  { %v467_v13 = vpop.f32.mrf.mxu3 }
  0xa1   :  { %v404_v41 = vpop.f32.mrf.mxu0 }
  0xa2   :  { %v405_v43 = vadd.f32 %v404_v41, %v117_v9  ;;  %741 = vperm.xlu2 %1678, %v587_v38   ;;  %v1135_v41 = vld [vmem:[%s2557_s5 + $0x80] sm:$0xff] }
  0xa3   :  { %736 = vperm.xlu1 %1677, %v586_v39   ;;  %731 = vperm.xlu0 %1676, %v585_v40   ;;  %v257_v39 = vpop.permute.xlu2 %256 }
  0xa4   :  { %v480_v45 = vmax.f32 %v405_v43, 0.0 }
  0xa5   :  { %v2057_v61 = vpop.permute.xlu0 %191  ;;  %v2062_v3 = vpop.permute.xlu1 %196 }
  0xa6   :  { %v2024_v47 = vpack.c.bf16 %v480_v45, %v479_v44  ;;  %v1134_v44 = vld [vmem:[%s2557_s5 + $0x78] sm:$0xff]  ;;  %v1133_v45 = vld [vmem:[%s2557_s5 + $0x70] sm:$0xff] }
  0xa8   :  { %v469_v26 = vpop.f32.mrf.mxu3 }
  0xa9   :  { %v407_v53 = vpop.f32.mrf.mxu0 }
  0xaa   :  { %1158 = vperm.xlu2 %1678, %v1120_v49   ;;  %v408_v58 = vadd.f32 %v407_v53, %v1947_v4 }
  0xab   :  { %1153 = vperm.xlu1 %1677, %v1119_v50   ;;  %746 = vperm.xlu0 %1676, %v588_v51  }
  0xac   :  { %1474 = vmatmul.msk.bf16.gmra.mxu0 %vm339_vm0, %v1618_v52  ;;  %v481_v0 = vmax.f32 %v408_v58, 0.0 }
  0xad   :  { %v2081_v12 = vpop.permute.xlu0 %206  ;;  %v2087_v16 = vpop.permute.xlu1 %211 }
  0xb0   :  { %v472_v38 = vpop.f32.mrf.mxu3 }
  0xb1   :  { %v409_v62 = vpop.f32.mrf.mxu0 }
  0xb2   :  { %v410_v63 = vadd.f32 %v409_v62, %v1961_v11  ;;  %1173 = vperm.xlu2 %1678, %v1123_v56  }
  0xb3   :  { %1168 = vperm.xlu1 %1677, %v1122_v59   ;;  %1163 = vperm.xlu0 %1676, %v1121_v60  }
  0xb4   :  { %v482_v1 = vmax.f32 %v410_v63, 0.0 }
  0xb5   :  { %v2098_v27 = vpop.permute.xlu0 %221  ;;  %v252_v35 = vpop.permute.xlu1 %251 }
  0xb6   :  { %v2064_v4 = vpack.c.bf16 %v482_v1, %v481_v0  ;;  %v473_v51 = vadd.f32 %v472_v38, %v252_v35  ;;  %v1138_v0 = vld [vmem:[%s2557_s5 + $0x98] sm:$0xff]  ;;  %v1145_v38 = vld [vmem:[%s2557_s5 + $0xd0] sm:$0xff] }
  0xb7   :  { %v1146_v35 = vld [vmem:[%s2557_s5 + $0xd8] sm:$0xff] }
  0xb8   :  { %v474_v58 = vpop.f32.mrf.mxu3  ;;  %v507_v62 = vmax.f32 %v473_v51, 0.0 }
  0xb9   :  { %v412_v9 = vpop.f32.mrf.mxu0  ;;  %v475_v60 = vadd.f32 %v474_v58, %v257_v39 }
  0xba   :  { %v413_v11 = vadd.f32 %v412_v9, %v1972_v15  ;;  %1188 = vperm.xlu2 %1678, %v1126_v5   ;;  %v1127_v15 = vld [vmem:[%s2557_s5 + $0x40] sm:$0xff]  ;;  %v1137_v5 = vld [vmem:[%s2557_s5 + $0x90] sm:$0xff] }
  0xbb   :  { %1183 = vperm.xlu1 %1677, %v1125_v6   ;;  %1178 = vperm.xlu0 %1676, %v1124_v7   ;;  %v508_v1 = vmax.f32 %v475_v60, 0.0  ;;  %v1136_v6 = vld [vmem:[%s2557_s5 + $0x88] sm:$0xff] }
  0xbc   :  { %1475 = vmatmul.msk.bf16.gmra.mxu0 %vm339_vm0, %v1619_v8  ;;  %v483_v22 = vmax.f32 %v413_v11, 0.0 }
  0xbd   :  { %v242_v40 = vpop.permute.xlu0 %241  ;;  %v247_v52 = vpop.permute.xlu1 %246 }
  0xbe   :  { %v470_v59 = vadd.f32 %v469_v26, %v247_v52 }
  0xc0   :  { %v506_v11 = vmax.f32 %v470_v59, 0.0 }
  0xc1   :  { %v414_v19 = vpop.f32.mrf.mxu0 }
  0xc2   :  { %v415_v20 = vadd.f32 %v414_v19, %v1975_v18  ;;  %1203 = vperm.xlu2 %1678, %v1129_v14   ;;  %v1131_v18 = vld [vmem:[%s2557_s5 + $0x60] sm:$0xff] }
  0xc3   :  { %1198 = vperm.xlu1 %1677, %v1128_v17   ;;  %1193 = vperm.xlu0 %1676, %v1127_v15   ;;  %v2139_v17 = vpack.c.bf16 %v508_v1, %v507_v62 }
  0xc4   :  { %v484_v24 = vmax.f32 %v415_v20, 0.0 }
  0xc5   :  { %v237_v7 = vpop.permute.xlu0 %236  ;;  %998 = vmatpush.bf16.msra.mxu2 %v2139_v17 }
  0xc6   :  { %v2100_v29 = vpack.c.bf16 %v484_v24, %v483_v22  ;;  %v465_v14 = vadd.f32 %v2060_v2, %v237_v7  ;;  %v1141_v22 = vld [vmem:[%s2557_s5 + $0xb0] sm:$0xff]  ;;  %v1139_v2 = vld [vmem:[%s2557_s5 + $0xa0] sm:$0xff] }
  0xc8   :  { %v504_v20 = vmax.f32 %v465_v14, 0.0  ;;  %v1651_v14 = vld [vmem:[%s2555_s3 + $0xd4] sm:$0xf0] }
  0xc9   :  { %v417_v34 = vpop.f32.mrf.mxu0 }
  0xca   :  { %1218 = vperm.xlu2 %1678, %v1132_v31   ;;  %v418_v43 = vadd.f32 %v417_v34, %v1986_v23  ;;  %v468_v23 = vadd.f32 %v467_v13, %v242_v40  ;;  %v1144_v31 = vld [vmem:[%s2557_s5 + $0xc8] sm:$0xff]  ;;  %v1147_v34 = vld [vmem:[%s2557_s5 + $0xe0] sm:$0xff]  ;;  %v1150_v40 = vld [vmem:[%s2557_s5 + $0xf8] sm:$0xff] }
  0xcb   :  { %1213 = vperm.xlu1 %1677, %v1131_v18   ;;  %1208 = vperm.xlu0 %1676, %v1130_v32   ;;  %v1143_v18 = vld [vmem:[%s2557_s5 + $0xc0] sm:$0xff]  ;;  %v1142_v32 = vld [vmem:[%s2557_s5 + $0xb8] sm:$0xff] }
  0xcc   :  { %1476 = vmatmul.msk.bf16.gmra.mxu0 %vm339_vm0, %v1620_v33  ;;  %v485_v53 = vmax.f32 %v418_v43, 0.0  ;;  %v505_v9 = vmax.f32 %v468_v23, 0.0  ;;  %v1148_v43 = vld [vmem:[%s2557_s5 + $0xe8] sm:$0xff] }
  0xce   :  { %v2142_v15 = vpack.c.bf16 %v506_v11, %v505_v9  ;;  %v1490_v11 = vld [vmem:[%s2555_s3 + $0x10] sm:$0xf] }
  0xd0   :  { %999 = vmatpush.bf16.msra.mxu2 %v2142_v15 }
  0xd1   :  { %v419_v49 = vpop.f32.mrf.mxu0 }
  0xd2   :  { %v420_v50 = vadd.f32 %v419_v49, %v1988_v25  ;;  %1233 = vperm.xlu2 %1678, %v1135_v41   ;;  %v232_v25 = vpop.permute.xlu2 %231  ;;  %v1149_v41 = vld [vmem:[%s2557_s5 + $0xf0] sm:$0xff] }
  0xd3   :  { %1228 = vperm.xlu1 %1677, %v1134_v44   ;;  %1223 = vperm.xlu0 %1676, %v1133_v45   ;;  %v463_v13 = vadd.f32 %v2043_v55, %v232_v25  ;;  %v1140_v55 = vld [vmem:[%s2557_s5 + $0xa8] sm:$0xff] }
  0xd4   :  { %v486_v56 = vmax.f32 %v420_v50, 0.0 }
  0xd5   :  { %v503_v19 = vmax.f32 %v463_v13, 0.0  ;;  %v1627_v13 = vld [vmem:[%s2555_s3 + $0x14] sm:$0xf0] }
  0xd6   :  { %v2126_v63 = vpack.c.bf16 %v486_v56, %v485_v53 }
  0xd7   :  { %v2154_v26 = vpack.c.bf16 %v504_v20, %v503_v19 }
  0xd9   :  { %v422_v8 = vpop.f32.mrf.mxu0  ;;  %1000 = vmatpush.bf16.msra.mxu2 %v2154_v26 }
  0xda   :  { %1248 = vperm.xlu2 %1678, %v1138_v0   ;;  %v423_v60 = vadd.f32 %v422_v8, %v1995_v30 }
  0xdb   :  { %1243 = vperm.xlu1 %1677, %v1137_v5   ;;  %1238 = vperm.xlu0 %1676, %v1136_v6  }
  0xdc   :  { %v487_v25 = vmax.f32 %v423_v60, 0.0 }
  0xe1   :  { %v424_v24 = vpop.f32.mrf.mxu0 }
  0xe2   :  { %1263 = vperm.xlu2 %1678, %v1141_v22   ;;  %v425_v58 = vadd.f32 %v424_v24, %v2006_v36  ;;  %v1498_v22 = vld [vmem:[%s2555_s3 + $0x20] sm:$0xf]  ;;  %v1653_v24 = vld [vmem:[%s2555_s3 + $0xe4] sm:$0xf0] }
  0xe3   :  { %1258 = vperm.xlu1 %1677, %v1140_v55   ;;  %1253 = vperm.xlu0 %1676, %v1139_v2   ;;  %v1629_v55 = vld [vmem:[%s2555_s3 + $0x24] sm:$0xf0]  ;;  %v1594_v2 = vld [vmem:[%s2555_s3 + $0xe0] sm:$0xf] }
  0xe9   :  { %v427_v33 = vpop.f32.mrf.mxu0 }
  0xea   :  { %1278 = vperm.xlu2 %1678, %v1144_v31   ;;  %v428_v52 = vadd.f32 %v427_v33, %v2009_v37  ;;  %v1499_v31 = vor.u32 %v1629_v55, %v1498_v22  ;;  %v1506_v33 = vld [vmem:[%s2555_s3 + $0x30] sm:$0xf]  ;;  %v1639_v55 = vld [vmem:[%s2555_s3 + $0x74] sm:$0xf0] }
  0xeb   :  { %1273 = vperm.xlu1 %1677, %v1143_v18   ;;  %1268 = vperm.xlu0 %1676, %v1142_v32   ;;  %v1595_v18 = vor.u32 %v1653_v24, %v1594_v2  ;;  %v1538_v22 = vld [vmem:[%s2555_s3 + $0x70] sm:$0xf]  ;;  %v2329_v2 = vpop.permute.xlu0 %596 }
  0xec   :  { %v489_v62 = vmax.f32 %v428_v52, 0.0  ;;  %v1539_v24 = vor.u32 %v1639_v55, %v1538_v22  ;;  %v1640_v22 = vld [vmem:[%s2555_s3 + $0x84] sm:$0xf]  ;;  %v1548_v55 = vld [vmem:[%s2555_s3 + $0x88] sm:$0xf0] }
  0xf1   :  { %v429_v39 = vpop.f32.mrf.mxu0 }
  0xf2   :  { %1293 = vperm.xlu2 %1678, %v1147_v34   ;;  %v430_v50 = vadd.f32 %v429_v39, %v2020_v42  ;;  %v1655_v39 = vld [vmem:[%s2555_s3 + $0xf4] sm:$0xf0] }
  0xf3   :  { %1288 = vperm.xlu1 %1677, %v1146_v35   ;;  %1283 = vperm.xlu0 %1676, %v1145_v38   ;;  %v1631_v35 = vld [vmem:[%s2555_s3 + $0x34] sm:$0xf0]  ;;  %v1602_v38 = vld [vmem:[%s2555_s3 + $0xf0] sm:$0xf] }
  0xf4   :  { %v490_v23 = vmax.f32 %v430_v50, 0.0 }
  0xf6   :  { %v547_v1 = vpack.c.bf16 %v490_v23, %v489_v62 }
  0xf9   :  { %v432_v44 = vpop.f32.mrf.mxu0 }
  0xfa   :  { %1308 = vperm.xlu2 %1678, %v1150_v40   ;;  %v433_v45 = vadd.f32 %v432_v44, %v2022_v46  ;;  %v488_v46 = vmax.f32 %v425_v58, 0.0  ;;  %v227_v40 = vpop.permute.xlu1 %226 }
  0xfb   :  { %1303 = vperm.xlu1 %1677, %v1149_v41   ;;  %1298 = vperm.xlu0 %1676, %v1148_v43  }
  0xfc   :  { %v491_v53 = vmax.f32 %v433_v45, 0.0  ;;  %v546_v42 = vpack.c.bf16 %v488_v46, %v487_v25  ;;  %v1507_v45 = vor.u32 %v1631_v35, %v1506_v33 }
 0x101   :  { %v434_v49 = vpop.f32.mrf.mxu0 }
 0x102   :  { %v435_v51 = vadd.f32 %v434_v49, %v2026_v48  ;;  %v1603_v49 = vor.u32 %v1655_v39, %v1602_v38  ;;  %v2347_v39 = vpop.permute.xlu0 %611 }
 0x104   :  { %v492_v56 = vmax.f32 %v435_v51, 0.0 }
 0x106   :  { %v548_v59 = vpack.c.bf16 %v492_v56, %v491_v53 }
 0x108   :  { %909 = vmatpush.bf16.msra.mxu1 %v548_v59  ;;  %1658 = vmatpush.bf16.msrb.mxu3 %v548_v59 }
 0x109   :  { %v437_v0 = vpop.f32.mrf.mxu0 }
 0x10a   :  { %v438_v37 = vadd.f32 %v437_v0, %v2040_v54  ;;  %v1482_v54 = vld [vmem:[%s2555_s3] sm:$0xf] }
 0x10c   :  { %910 = vmatpush.bf16.msra.mxu1 %v547_v1  ;;  %1659 = vmatpush.bf16.msrb.mxu3 %v547_v1  ;;  %v493_v5 = vmax.f32 %v438_v37, 0.0  ;;  %v1648_v37 = vld [vmem:[%s2555_s3 + $0xc4] sm:$0xf] }
 0x110   :  { %911 = vmatpush.bf16.msra.mxu1 %v546_v42  ;;  %1660 = vmatpush.bf16.msrb.mxu3 %v546_v42  ;;  %v1484_v42 = vld [vmem:[%s2555_s3 + $0x8] sm:$0xf0] }
 0x111   :  { %v439_v48 = vpop.f32.mrf.mxu0 }
 0x112   :  { %v440_v36 = vadd.f32 %v439_v48, %v2048_v57  ;;  %v1625_v57 = vld [vmem:[%s2555_s3 + $0x4] sm:$0xf0]  ;;  %v1580_v48 = vld [vmem:[%s2555_s3 + $0xc8] sm:$0xf0] }
 0x113   :  { %v1483_v8 = vor.u32 %v1625_v57, %v1482_v54  ;;  %v1626_v57 = vld [vmem:[%s2555_s3 + $0x14] sm:$0xf] }
 0x114   :  { %v494_v6 = vmax.f32 %v440_v36, 0.0  ;;  %912 = vmatpush.bf16.msra.mxu1 %v2126_v63  ;;  %1661 = vmatpush.bf16.msrb.mxu3 %v2126_v63 }
 0x116   :  { %v2194_v30 = vpack.c.bf16 %v494_v6, %v493_v5  ;;  %v1583_v5 = vor.u32 %v1648_v37, %v1580_v48  ;;  %v1522_v6 = vld [vmem:[%s2555_s3 + $0x50] sm:$0xf]  ;;  %v1532_v37 = vld [vmem:[%s2555_s3 + $0x68] sm:$0xf0] }
 0x118   :  { %913 = vmatpush.bf16.msra.mxu1 %v2100_v29  ;;  %1662 = vmatpush.bf16.msrb.mxu3 %v2100_v29  ;;  %v1578_v29 = vld [vmem:[%s2555_s3 + $0xc0] sm:$0xf] }
 0x119   :  { %v2198_v7 = vpop.f32.mrf.mxu0 }
 0x11c   :  { %914 = vmatpush.bf16.msra.mxu1 %v2064_v4  ;;  %1663 = vmatpush.bf16.msrb.mxu3 %v2064_v4  ;;  %v1649_v4 = vld [vmem:[%s2555_s3 + $0xc4] sm:$0xf0] }
 0x11d   :  { %v1579_v9 = vor.u32 %v1649_v4, %v1578_v29  ;;  %v1492_v29 = vld [vmem:[%s2555_s3 + $0x18] sm:$0xf0] }
 0x11e   :  { %v1588_v4 = vld [vmem:[%s2555_s3 + $0xd8] sm:$0xf0] }
 0x120   :  { %915 = vmatpush.bf16.msra.mxu1 %v2024_v47  ;;  %1664 = vmatpush.bf16.msrb.mxu3 %v2024_v47 }
 0x121   :  { %v444_v63 = vpop.f32.mrf.mxu0 }
 0x124   :  { %916 = vmatpush.bf16.msra.mxu1 %v1990_v28  ;;  %1665 = vmatpush.bf16.msrb.mxu3 %v1990_v28  ;;  %v1586_v28 = vld [vmem:[%s2555_s3 + $0xd0] sm:$0xf] }
 0x125   :  { %v1587_v19 = vor.u32 %v1651_v14, %v1586_v28  ;;  %v1500_v28 = vld [vmem:[%s2555_s3 + $0x28] sm:$0xf0]  ;;  %v1652_v14 = vld [vmem:[%s2555_s3 + $0xe4] sm:$0xf] }
 0x127   :  { %917 = vmatmul.bf16.vlgmr.msra.gmra.mxu1 %v1483_v8  ;;  %977 = vmatmul.bf16.vlgmr.msrb.gmra.mxu3 %v1579_v9  ;;  %v1530_v9 = vld [vmem:[%s2555_s3 + $0x60] sm:$0xf] }
 0x128   :  { %1666 = vmatpush.bf16.msra.mxu3 %v2139_v17 }
 0x129   :  { %v447_v47 = vpop.f32.mrf.mxu0 }
 0x12a   :  { %v448_v58 = vadd.f32 %v447_v47, %v2078_v10  ;;  %v1514_v10 = vld [vmem:[%s2555_s3 + $0x40] sm:$0xf]  ;;  %v1637_v47 = vld [vmem:[%s2555_s3 + $0x64] sm:$0xf0] }
 0x12c   :  { %1667 = vmatpush.bf16.msra.mxu3 %v2142_v15  ;;  %v1491_v15 = vor.u32 %v1627_v13, %v1490_v11  ;;  %v497_v62 = vmax.f32 %v448_v58, 0.0  ;;  %v1531_v11 = vor.u32 %v1637_v47, %v1530_v9  ;;  %v1628_v13 = vld [vmem:[%s2555_s3 + $0x24] sm:$0xf]  ;;  %v1643_v58 = vld [vmem:[%s2555_s3 + $0x94] sm:$0xf0] }
 0x12d   :  { %v1638_v9 = vld [vmem:[%s2555_s3 + $0x74] sm:$0xf]  ;;  %v1540_v47 = vld [vmem:[%s2555_s3 + $0x78] sm:$0xf0] }
 0x130   :  { %1668 = vmatpush.bf16.msra.mxu3 %v2154_v26 }
 0x131   :  { %v449_v17 = vpop.f32.mrf.mxu0 }
 0x132   :  { %v450_v52 = vadd.f32 %v449_v17, %v2081_v12  ;;  %v1596_v17 = vld [vmem:[%s2555_s3 + $0xe8] sm:$0xf0] }
 0x134   :  { %v498_v59 = vmax.f32 %v450_v52, 0.0 }
 0x136   :  { %v551_v0 = vpack.c.bf16 %v498_v59, %v497_v62  ;;  %v1524_v62 = vld [vmem:[%s2555_s3 + $0x58] sm:$0xf0] }
 0x137   :  { %922 = vmatmul.bf16.gmra.mxu1 %v1491_v15  ;;  %982 = vmatmul.bf16.gmra.mxu3 %v1587_v19  ;;  %v1503_v15 = vor.u32 %v1628_v13, %v1500_v28  ;;  %v1599_v19 = vor.u32 %v1652_v14, %v1596_v17 }
 0x139   :  { %v452_v20 = vpop.f32.mrf.mxu0 }
 0x141   :  { %v454_v26 = vpop.f32.mrf.mxu0 }
 0x142   :  { %v455_v43 = vadd.f32 %v454_v26, %v2096_v21  ;;  %v445_v21 = vadd.f32 %v444_v63, %v2062_v3  ;;  %v1633_v3 = vld [vmem:[%s2555_s3 + $0x44] sm:$0xf0]  ;;  %v1495_v63 = vor.u32 %v1626_v57, %v1492_v29  ;;  %v1630_v26 = vld [vmem:[%s2555_s3 + $0x34] sm:$0xf]  ;;  %v1570_v29 = vld [vmem:[%s2555_s3 + $0xb0] sm:$0xf] }
 0x143   :  { %v1515_v25 = vor.u32 %v1633_v3, %v1514_v10 }
 0x144   :  { %v500_v53 = vmax.f32 %v455_v43, 0.0  ;;  %v496_v12 = vmax.f32 %v445_v21, 0.0  ;;  %v1546_v43 = vld [vmem:[%s2555_s3 + $0x80] sm:$0xf] }
 0x147   :  { %927 = vmatmul.bf16.gmra.mxu1 %v1499_v31  ;;  %987 = vmatmul.bf16.gmra.mxu3 %v1595_v18  ;;  %v1508_v31 = vld [vmem:[%s2555_s3 + $0x38] sm:$0xf0]  ;;  %v1654_v18 = vld [vmem:[%s2555_s3 + $0xf4] sm:$0xf] }
 0x148   :  { %v1511_v35 = vor.u32 %v1630_v26, %v1508_v31  ;;  %v1551_v31 = vor.u32 %v1640_v22, %v1548_v55 }
 0x149   :  { %v457_v32 = vpop.f32.mrf.mxu0 }
 0x14a   :  { %v458_v34 = vadd.f32 %v457_v32, %v2098_v27  ;;  %v453_v27 = vadd.f32 %v452_v20, %v2087_v16  ;;  %v443_v16 = vadd.f32 %v2198_v7, %v2057_v61  ;;  %v1624_v61 = vld [vmem:[%s2555_s3 + $0x4] sm:$0xf]  ;;  %v1635_v7 = vld [vmem:[%s2555_s3 + $0x54] sm:$0xf0]  ;;  %v2321_v20 = vpop.permute.xlu2 %591  ;;  %v1604_v32 = vld [vmem:[%s2555_s3 + $0xf8] sm:$0xf0] }
 0x14b   :  { %v1487_v36 = vor.u32 %v1624_v61, %v1484_v42  ;;  %v1523_v54 = vor.u32 %v1635_v7, %v1522_v6  ;;  %v1607_v38 = vor.u32 %v1654_v18, %v1604_v32  ;;  %v1636_v42 = vld [vmem:[%s2555_s3 + $0x64] sm:$0xf] }
 0x14c   :  { %v501_v50 = vmax.f32 %v458_v34, 0.0  ;;  %v499_v23 = vmax.f32 %v453_v27, 0.0  ;;  %v495_v46 = vmax.f32 %v443_v16, 0.0  ;;  %v2345_v34 = vpop.permute.xlu1 %601  ;;  %v1516_v27 = vld [vmem:[%s2555_s3 + $0x48] sm:$0xf0] }
 0x14d   :  { %v1634_v16 = vld [vmem:[%s2555_s3 + $0x54] sm:$0xf] }
 0x14e   :  { %v552_v60 = vpack.c.bf16 %v500_v53, %v499_v23  ;;  %v550_v1 = vpack.c.bf16 %v496_v12, %v495_v46  ;;  %v1527_v12 = vor.u32 %v1634_v16, %v1524_v62 }
 0x151   :  { %v459_v41 = vpop.f32.mrf.mxu0 }
 0x152   :  { %v460_v44 = vadd.f32 %v459_v41, %v227_v40  ;;  %v2343_v33 = vpop.permute.xlu2 %606 }
 0x154   :  { %v502_v51 = vmax.f32 %v460_v44, 0.0  ;;  %v2351_v41 = vpop.permute.xlu1 %616  ;;  %v1641_v44 = vld [vmem:[%s2555_s3 + $0x84] sm:$0xf0] }
 0x156   :  { %v553_v56 = vpack.c.bf16 %v502_v51, %v501_v50  ;;  %v2365_v50 = vpop.permute.xlu0 %626 }
 0x157   :  { %932 = vmatmul.bf16.gmra.mxu1 %v1507_v45  ;;  %992 = vmatmul.bf16.gmra.mxu3 %v1603_v49  ;;  %v1547_v45 = vor.u32 %v1641_v44, %v1546_v43  ;;  %v1632_v49 = vld [vmem:[%s2555_s3 + $0x44] sm:$0xf] }
 0x158   :  { %1001 = vmatpush.bf16.msra.mxu2 %v553_v56  ;;  %1669 = vmatpush.bf16.msra.mxu3 %v553_v56  ;;  %v1519_v51 = vor.u32 %v1632_v49, %v1516_v27  ;;  %v1554_v56 = vld [vmem:[%s2555_s3 + $0x90] sm:$0xf]  ;;  %v1642_v49 = vld [vmem:[%s2555_s3 + $0x94] sm:$0xf]  ;;  %v1556_v27 = vld [vmem:[%s2555_s3 + $0x98] sm:$0xf0] }
 0x159   :  { %v1555_v21 = vor.u32 %v1643_v58, %v1554_v56 }
 0x15a   :  { %v2349_v40 = vpop.permute.xlu2 %621 }
 0x15c   :  { %1002 = vmatpush.bf16.msra.mxu2 %v552_v60  ;;  %1670 = vmatpush.bf16.msra.mxu3 %v552_v60  ;;  %v2369_v53 = vpop.permute.xlu1 %631 }
 0x15e   :  { %v2377_v23 = vpop.permute.xlu0 %641 }
 0x160   :  { %1003 = vmatpush.bf16.msra.mxu2 %v551_v0  ;;  %1671 = vmatpush.bf16.msra.mxu3 %v551_v0 }
 0x162   :  { %v2367_v52 = vpop.permute.xlu2 %636 }
 0x164   :  { %1004 = vmatpush.bf16.msra.mxu2 %v550_v1  ;;  %1672 = vmatpush.bf16.msra.mxu3 %v550_v1  ;;  %v2381_v60 = vpop.permute.xlu1 %646  ;;  %v1562_v1 = vld [vmem:[%s2555_s3 + $0xa0] sm:$0xf] }
 0x166   :  { %v2389_v0 = vpop.permute.xlu0 %656 }
 0x167   :  { %937 = vmatmul.bf16.gmra.mxu1 %v1515_v25  ;;  %v1645_v25 = vld [vmem:[%s2555_s3 + $0xa4] sm:$0xf0] }
 0x168   :  { %1005 = vmatpush.bf16.msra.mxu2 %v2194_v30  ;;  %1673 = vmatpush.bf16.msra.mxu3 %v2194_v30  ;;  %v1650_v30 = vld [vmem:[%s2555_s3 + $0xd4] sm:$0xf]  ;;  %v1563_v61 = vor.u32 %v1645_v25, %v1562_v1 }
 0x169   :  { %v1591_v8 = vor.u32 %v1650_v30, %v1588_v4  ;;  %v1647_v30 = vld [vmem:[%s2555_s3 + $0xb4] sm:$0xf0] }
 0x16a   :  { %v2379_v59 = vpop.permute.xlu2 %651 }
 0x16b   :  { %1006 = vmatmul.bf16.vlgmr.msra.gmra.mxu2 %v1487_v36  ;;  %1066 = vmatmul.bf16.vlgmr.msra.gmra.mxu3 %v1583_v5  ;;  %v1535_v5 = vor.u32 %v1636_v42, %v1532_v37 }
 0x16c   :  { %v2393_v3 = vpop.permute.xlu1 %661 }
 0x16e   :  { %v2407_v48 = vpop.permute.xlu0 %671 }
 0x172   :  { %v2391_v10 = vpop.permute.xlu2 %666 }
 0x174   :  { %v2411_v7 = vpop.permute.xlu1 %676 }
 0x177   :  { %942 = vmatmul.bf16.gmra.mxu1 %v1523_v54  ;;  %v2413_v54 = vpop.permute.xlu0 %686 }
 0x17a   :  { %v2409_v6 = vpop.permute.xlu2 %681 }
 0x17b   :  { %1011 = vmatmul.bf16.gmra.mxu2 %v1495_v63  ;;  %1071 = vmatmul.bf16.gmra.mxu3 %v1591_v8  ;;  %v1571_v8 = vor.u32 %v1647_v30, %v1570_v29 }
 0x17c   :  { %v2423_v63 = vpop.permute.xlu1 %691 }
 0x17f   :  { %v2431_v13 = vpop.permute.xlu0 %701 }
 0x182   :  { %v2421_v4 = vpop.permute.xlu2 %696 }
 0x184   :  { %v2435_v17 = vpop.permute.xlu1 %706 }
 0x187   :  { %947 = vmatmul.bf16.gmra.mxu1 %v1531_v11  ;;  %v1543_v11 = vor.u32 %v1638_v9, %v1540_v47  ;;  %v1644_v9 = vld [vmem:[%s2555_s3 + $0xa4] sm:$0xf]  ;;  %v1564_v47 = vld [vmem:[%s2555_s3 + $0xa8] sm:$0xf0] }
 0x18a   :  { %v2433_v14 = vpop.permute.xlu2 %711 }
 0x18b   :  { %1016 = vmatmul.bf16.gmra.mxu2 %v1503_v15  ;;  %1076 = vmatmul.bf16.gmra.mxu3 %v1599_v19  ;;  %v2437_v15 = vpop.permute.xlu0 %716 }
 0x18c   :  { %v2447_v26 = vpop.permute.xlu1 %721 }
 0x193   :  { %v2449_v18 = vpop.permute.xlu0 %731 }
 0x197   :  { %952 = vmatmul.bf16.gmra.mxu1 %v1539_v24  ;;  %v2445_v24 = vpop.permute.xlu2 %726 }
 0x19b   :  { %1021 = vmatmul.bf16.gmra.mxu2 %v1511_v35  ;;  %1081 = vmatmul.bf16.gmra.mxu3 %v1607_v38  ;;  %v2463_v16 = vpop.permute.xlu0 %746 }
 0x19c   :  { %2560 = vst [vmem:[#allocation6_spill] sm:$0xff] %v2463_v16 }
 0x19f   :  { %v2452_v44 = vpop.permute.xlu2 %741 }
 0x1a4   :  { %v918_v46 = vpop.f32.mrf.mxu1 }
 0x1a5   :  { %v919_v32 = vadd.f32 %v918_v46, %v2321_v20 }
 0x1a7   :  { %957 = vmatmul.bf16.gmra.mxu1 %v1547_v45  ;;  %v2454_v45 = vpop.permute.xlu1 %736  ;;  %v1159_v46 = vpop.permute.xlu2 %1158 }
 0x1ab   :  { %1026 = vmatmul.bf16.gmra.mxu2 %v1519_v51 }
 0x1ac   :  { %v920_v36 = vpop.f32.mrf.mxu1 }
 0x1ad   :  { %v921_v51 = vadd.f32 %v920_v36, %v2329_v2  ;;  %v1164_v2 = vpop.permute.xlu0 %1163 }
 0x1af   :  { %v1154_v1 = vpop.permute.xlu1 %1153 }
 0x1b4   :  { %v923_v57 = vpop.f32.mrf.mxu1 }
 0x1b5   :  { %v924_v42 = vadd.f32 %v923_v57, %v2345_v34  ;;  %v1567_v57 = vor.u32 %v1644_v9, %v1564_v47 }
 0x1b7   :  { %962 = vmatmul.bf16.gmra.mxu1 %v1555_v21  ;;  %v1559_v21 = vor.u32 %v1642_v49, %v1556_v27 }
 0x1bb   :  { %1031 = vmatmul.bf16.gmra.mxu2 %v1527_v12 }
 0x1bc   :  { %v925_v28 = vpop.f32.mrf.mxu1 }
 0x1c4   :  { %v928_v19 = vpop.f32.mrf.mxu1 }
 0x1c5   :  { %v929_v49 = vadd.f32 %v928_v19, %v2347_v39 }
 0x1c7   :  { %967 = vmatmul.bf16.gmra.mxu1 %v1563_v61 }
 0x1cb   :  { %1036 = vmatmul.bf16.gmra.mxu2 %v1535_v5 }
 0x1cc   :  { %v930_v35 = vpop.f32.mrf.mxu1 }
 0x1d4   :  { %v933_v62 = vpop.f32.mrf.mxu1 }
 0x1d7   :  { %972 = vmatmul.bf16.gmra.mxu1 %v1571_v8 }
 0x1db   :  { %1041 = vmatmul.bf16.gmra.mxu2 %v1543_v11  ;;  %v926_v11 = vadd.f32 %v925_v28, %v2343_v33  ;;  %v1646_v33 = vld [vmem:[%s2555_s3 + $0xb4] sm:$0xf]  ;;  %v1572_v28 = vld [vmem:[%s2555_s3 + $0xb8] sm:$0xf0] }
 0x1dc   :  { %v935_v36 = vpop.f32.mrf.mxu1  ;;  %v1575_v19 = vor.u32 %v1646_v33, %v1572_v28 }
 0x1eb   :  { %1046 = vmatmul.bf16.gmra.mxu2 %v1551_v31 }
 0x1ee   :  { %v1007_v38 = vpop.f32.mrf.mxu2 }
 0x1ef   :  { %v1008_v43 = vadd.f32 %v1007_v38, %v919_v32  ;;  %v1169_v32 = vpop.permute.xlu1 %1168 }
 0x1f1   :  { %v1087_v58 = vmax.f32 %v1008_v43, 0.0  ;;  %v938_v43 = vpop.f32.mrf.mxu1 }
 0x1f3   :  { %v1311_v25 = vmul.f32 %v1154_v1, %v1087_v58 }
 0x1f6   :  { %v1009_v56 = vpop.f32.mrf.mxu2 }
 0x1f7   :  { %v1010_v20 = vadd.f32 %v1009_v56, %v921_v51 }
 0x1f9   :  { %v1088_v12 = vmax.f32 %v1010_v20, 0.0  ;;  %v1174_v20 = vpop.permute.xlu2 %1173  ;;  %v940_v1 = vpop.f32.mrf.mxu1 }
 0x1fb   :  { %v1312_v61 = vmul.f32 %v1159_v46, %v1088_v12  ;;  %1051 = vmatmul.bf16.gmra.mxu2 %v1559_v21  ;;  %v931_v12 = vadd.f32 %v930_v35, %v2351_v41  ;;  %v936_v35 = vadd.f32 %v935_v36, %v2365_v50  ;;  %v941_v36 = vadd.f32 %v940_v1, %v2367_v52 }
 0x1fd   :  { %v1343_v37 = vadd.f32 %v1312_v61, %v1311_v25 }
 0x1fe   :  { %v1012_v5 = vpop.f32.mrf.mxu2 }
 0x1ff   :  { %v1013_v29 = vadd.f32 %v1012_v5, %v924_v42  ;;  %v1179_v42 = vpop.permute.xlu0 %1178  ;;  %v2481_v5 = vpop.f32.mrf.mxu3 }
 0x201   :  { %v1089_v30 = vmax.f32 %v1013_v29, 0.0  ;;  %v934_v29 = vadd.f32 %v933_v62, %v2349_v40  ;;  %v943_v9 = vpop.f32.mrf.mxu1  ;;  %v939_v40 = vadd.f32 %v938_v43, %v2369_v53 }
 0x202   :  { %v944_v53 = vadd.f32 %v943_v9, %v2377_v23 }
 0x203   :  { %v1313_v8 = vmul.f32 %v1164_v2, %v1089_v30 }
 0x205   :  { %v1344_v22 = vadd.f32 %v1343_v37, %v1313_v8 }
 0x206   :  { %v1014_v55 = vpop.f32.mrf.mxu2 }
 0x207   :  { %v1015_v34 = vadd.f32 %v1014_v55, %v926_v11  ;;  %v1184_v11 = vpop.permute.xlu1 %1183  ;;  %v2485_v55 = vpop.f32.mrf.mxu3 }
 0x209   :  { %v1090_v31 = vmax.f32 %v1015_v34, 0.0 }
 0x20b   :  { %v1314_v38 = vmul.f32 %v1169_v32, %v1090_v31  ;;  %1056 = vmatmul.bf16.gmra.mxu2 %v1567_v57  ;;  %v1189_v32 = vpop.permute.xlu2 %1188 }
 0x20d   :  { %v1345_v27 = vadd.f32 %v1344_v22, %v1314_v38  ;;  %v945_v38 = vpop.f32.mrf.mxu1 }
 0x20e   :  { %v1017_v51 = vpop.f32.mrf.mxu2  ;;  %v946_v52 = vadd.f32 %v945_v38, %v2381_v60 }
 0x20f   :  { %v1018_v56 = vadd.f32 %v1017_v51, %v929_v49 }
 0x211   :  { %v1091_v58 = vmax.f32 %v1018_v56, 0.0  ;;  %v2488_v56 = vpop.f32.mrf.mxu3 }
 0x213   :  { %v1315_v21 = vmul.f32 %v1174_v20, %v1091_v58  ;;  %v1194_v20 = vpop.permute.xlu0 %1193 }
 0x215   :  { %v1346_v46 = vadd.f32 %v1345_v27, %v1315_v21  ;;  %v948_v50 = vpop.f32.mrf.mxu1 }
 0x216   :  { %v1019_v25 = vpop.f32.mrf.mxu2  ;;  %v949_v23 = vadd.f32 %v948_v50, %v2379_v59 }
 0x217   :  { %v1020_v39 = vadd.f32 %v1019_v25, %v931_v12  ;;  %v1199_v25 = vpop.permute.xlu1 %1198 }
 0x219   :  { %v1092_v61 = vmax.f32 %v1020_v39, 0.0  ;;  %v2491_v39 = vpop.f32.mrf.mxu3 }
 0x21b   :  { %v1316_v37 = vmul.f32 %v1179_v42, %v1092_v61  ;;  %1061 = vmatmul.bf16.gmra.mxu2 %v1575_v19 }
 0x21d   :  { %v1347_v30 = vadd.f32 %v1346_v46, %v1316_v37  ;;  %v950_v61 = vpop.f32.mrf.mxu1 }
 0x21e   :  { %v1022_v2 = vpop.f32.mrf.mxu2 }
 0x21f   :  { %v1023_v8 = vadd.f32 %v1022_v2, %v934_v29 }
 0x221   :  { %v1093_v47 = vmax.f32 %v1023_v8, 0.0  ;;  %v2494_v8 = vpop.f32.mrf.mxu3 }
 0x223   :  { %v1317_v41 = vmul.f32 %v1184_v11, %v1093_v47 }
 0x225   :  { %v1348_v22 = vadd.f32 %v1347_v30, %v1317_v41  ;;  %v1204_v30 = vpop.permute.xlu2 %1203  ;;  %v953_v41 = vpop.f32.mrf.mxu1 }
 0x226   :  { %v1024_v34 = vpop.f32.mrf.mxu2 }
 0x227   :  { %v1025_v57 = vadd.f32 %v1024_v34, %v936_v35 }
 0x229   :  { %v1094_v31 = vmax.f32 %v1025_v57, 0.0  ;;  %v2498_v57 = vpop.f32.mrf.mxu3 }
 0x22b   :  { %v1318_v49 = vmul.f32 %v1189_v32, %v1094_v31 }
 0x22d   :  { %v1349_v62 = vadd.f32 %v1348_v22, %v1318_v49  ;;  %v1209_v22 = vpop.permute.xlu0 %1208 }
 0x22e   :  { %v1027_v27 = vpop.f32.mrf.mxu2 }
 0x22f   :  { %v1028_v51 = vadd.f32 %v1027_v27, %v939_v40  ;;  %v1214_v40 = vpop.permute.xlu1 %1213 }
 0x231   :  { %v1095_v58 = vmax.f32 %v1028_v51, 0.0  ;;  %v2500_v38 = vpop.f32.mrf.mxu3 }
 0x232   :  { %2561 = vst [vmem:[#allocation7_spill] sm:$0xff] %v2500_v38 }
 0x233   :  { %v1319_v21 = vmul.f32 %v1194_v20, %v1095_v58 }
 0x235   :  { %v1350_v33 = vadd.f32 %v1349_v62, %v1319_v21  ;;  %v955_v62 = vpop.f32.mrf.mxu1 }
 0x236   :  { %v1029_v28 = vpop.f32.mrf.mxu2 }
 0x237   :  { %v1030_v12 = vadd.f32 %v1029_v28, %v941_v36 }
 0x239   :  { %v1096_v46 = vmax.f32 %v1030_v12, 0.0  ;;  %v2502_v21 = vpop.f32.mrf.mxu3 }
 0x23a   :  { %2562 = vst [vmem:[#allocation8_spill] sm:$0xff] %v2502_v21 }
 0x23b   :  { %v1320_v19 = vmul.f32 %v1199_v25, %v1096_v46 }
 0x23d   :  { %v1351_v43 = vadd.f32 %v1350_v33, %v1320_v19  ;;  %v958_v58 = vpop.f32.mrf.mxu1  ;;  %v1219_v19 = vpop.permute.xlu2 %1218 }
 0x23e   :  { %v1032_v42 = vpop.f32.mrf.mxu2 }
 0x23f   :  { %v1033_v37 = vadd.f32 %v1032_v42, %v944_v53  ;;  %v1224_v42 = vpop.permute.xlu0 %1223 }
 0x241   :  { %v1097_v29 = vmax.f32 %v1033_v37, 0.0  ;;  %v2504_v59 = vpop.f32.mrf.mxu3 }
 0x243   :  { %v1321_v2 = vmul.f32 %v1204_v30, %v1097_v29  ;;  %v1229_v29 = vpop.permute.xlu1 %1228 }
 0x245   :  { %v1352_v1 = vadd.f32 %v1351_v43, %v1321_v2  ;;  %v960_v36 = vpop.f32.mrf.mxu1  ;;  %v1234_v2 = vpop.permute.xlu2 %1233 }
 0x246   :  { %v1034_v47 = vpop.f32.mrf.mxu2  ;;  %v961_v16 = vadd.f32 %v960_v36, %v2411_v7 }
 0x247   :  { %v1035_v11 = vadd.f32 %v1034_v47, %v946_v52  ;;  %v1239_v47 = vpop.permute.xlu0 %1238 }
 0x249   :  { %v1098_v35 = vmax.f32 %v1035_v11, 0.0  ;;  %v2506_v12 = vpop.f32.mrf.mxu3  ;;  %v954_v11 = vadd.f32 %v953_v41, %v2393_v3 }
 0x24b   :  { %v1322_v34 = vmul.f32 %v1209_v22, %v1098_v35 }
 0x24d   :  { %v1353_v9 = vadd.f32 %v1352_v1, %v1322_v34  ;;  %v963_v28 = vpop.f32.mrf.mxu1  ;;  %v951_v1 = vadd.f32 %v950_v61, %v2389_v0 }
 0x24e   :  { %v1037_v31 = vpop.f32.mrf.mxu2  ;;  %v964_v3 = vadd.f32 %v963_v28, %v2409_v6 }
 0x24f   :  { %v1038_v32 = vadd.f32 %v1037_v31, %v949_v23  ;;  %v956_v23 = vadd.f32 %v955_v62, %v2391_v10  ;;  %v1244_v31 = vpop.permute.xlu1 %1243 }
 0x251   :  { %v1099_v49 = vmax.f32 %v1038_v32, 0.0  ;;  %v2508_v53 = vpop.f32.mrf.mxu3  ;;  %v1249_v32 = vpop.permute.xlu2 %1248 }
 0x253   :  { %v1323_v27 = vmul.f32 %v1214_v40, %v1099_v49  ;;  %v959_v49 = vadd.f32 %v958_v58, %v2407_v48  ;;  %v1254_v48 = vpop.permute.xlu0 %1253 }
 0x255   :  { %v1354_v51 = vadd.f32 %v1353_v9, %v1323_v27  ;;  %v965_v25 = vpop.f32.mrf.mxu1 }
 0x256   :  { %v1039_v60 = vpop.f32.mrf.mxu2  ;;  %v966_v10 = vadd.f32 %v965_v25, %v2413_v54 }
 0x257   :  { %v1040_v35 = vadd.f32 %v1039_v60, %v951_v1 }
 0x259   :  { %v2510_v52 = vpop.f32.mrf.mxu3  ;;  %v1100_v40 = vmax.f32 %v1040_v35, 0.0  ;;  %v1264_v28 = vpop.permute.xlu2 %1263 }
 0x25b   :  { %v1324_v41 = vmul.f32 %v1219_v19, %v1100_v40 }
 0x25d   :  { %v968_v37 = vpop.f32.mrf.mxu1  ;;  %v1355_v35 = vadd.f32 %v1354_v51, %v1324_v41 }
 0x25e   :  { %v1042_v20 = vpop.f32.mrf.mxu2  ;;  %v969_v58 = vadd.f32 %v968_v37, %v2423_v63 }
 0x25f   :  { %v1043_v9 = vadd.f32 %v1042_v20, %v954_v11 }
 0x261   :  { %v2516_v21 = vpop.f32.mrf.mxu3  ;;  %v1101_v0 = vmax.f32 %v1043_v9, 0.0 }
 0x263   :  { %v1325_v62 = vmul.f32 %v1224_v42, %v1101_v0 }
 0x265   :  { %v970_v22 = vpop.f32.mrf.mxu1  ;;  %v1356_v19 = vadd.f32 %v1355_v35, %v1325_v62 }
 0x266   :  { %v1044_v33 = vpop.f32.mrf.mxu2  ;;  %v971_v6 = vadd.f32 %v970_v22, %v2421_v4  ;;  %v1269_v22 = vpop.permute.xlu0 %1268 }
 0x267   :  { %v1045_v27 = vadd.f32 %v1044_v33, %v956_v23 }
 0x269   :  { %v1102_v60 = vmax.f32 %v1045_v27, 0.0  ;;  %v1079_v54 = vpop.f32.mrf.mxu3 }
 0x26b   :  { %v1326_v23 = vmul.f32 %v1229_v29, %v1102_v60 }
 0x26d   :  { %v973_v33 = vpop.f32.mrf.mxu1 }
 0x26e   :  { %v1047_v50 = vpop.f32.mrf.mxu2  ;;  %v974_v25 = vadd.f32 %v973_v33, %v2431_v13  ;;  %v989_v33 = vadd.f32 %v2494_v8, %v2449_v18 }
 0x26f   :  { %v1048_v61 = vadd.f32 %v1047_v50, %v959_v49  ;;  %v1259_v50 = vpop.permute.xlu1 %1258 }
 0x271   :  { %v1103_v20 = vmax.f32 %v1048_v61, 0.0  ;;  %v1082_v62 = vpop.f32.mrf.mxu3 }
 0x275   :  { %v975_v61 = vpop.f32.mrf.mxu1 }
 0x276   :  { %v1049_v46 = vpop.f32.mrf.mxu2  ;;  %v976_v60 = vadd.f32 %v975_v61, %v2435_v17 }
 0x277   :  { %v1050_v1 = vadd.f32 %v1049_v46, %v961_v16  ;;  %v1327_v16 = vmul.f32 %v1234_v2, %v1103_v20  ;;  %v979_v2 = vadd.f32 %v2481_v5, %v2433_v14  ;;  %v1274_v41 = vpop.permute.xlu1 %1273 }
 0x279   :  { %v1104_v7 = vmax.f32 %v1050_v1, 0.0 }
 0x27b   :  { %v1328_v42 = vmul.f32 %v1239_v47, %v1104_v7  ;;  %v1279_v47 = vpop.permute.xlu2 %1278  ;;  %v991_v7 = vadd.f32 %v2498_v57, %v2454_v45 }
 0x27d   :  { %v1080_v8 = vadd.f32 %v1079_v54, %v991_v7 }
 0x27e   :  { %v1052_v43 = vpop.f32.mrf.mxu2 }
 0x27f   :  { %v1053_v11 = vadd.f32 %v1052_v43, %v964_v3  ;;  %v1357_v43 = vadd.f32 %v1356_v19, %v1326_v23 }
 0x281   :  { %v1105_v46 = vmax.f32 %v1053_v11, 0.0  ;;  %v1358_v51 = vadd.f32 %v1357_v43, %v1327_v16  ;;  %v1084_v43 = vpop.f32.mrf.mxu3 }
 0x283   :  { %v1329_v29 = vmul.f32 %v1244_v31, %v1105_v46  ;;  %v1359_v27 = vadd.f32 %v1358_v51, %v1328_v42  ;;  %v1068_v31 = vadd.f32 %v2504_v59, %v979_v2  ;;  %v2564_v46 = vld [vmem:[#allocation6_spill] sm:$0xff] }
 0x286   :  { %v1054_v30 = vpop.f32.mrf.mxu2 }
 0x287   :  { %v1055_v36 = vadd.f32 %v1054_v30, %v966_v10  ;;  %v984_v10 = vadd.f32 %v2488_v56, %v2447_v26 }
 0x289   :  { %v1106_v49 = vmax.f32 %v1055_v36, 0.0  ;;  %v1073_v59 = vadd.f32 %v2508_v53, %v984_v10  ;;  %v1289_v53 = vpop.permute.xlu1 %1288 }
 0x28b   :  { %v1330_v0 = vmul.f32 %v1249_v32, %v1106_v49 }
 0x28e   :  { %v1057_v34 = vpop.f32.mrf.mxu2 }
 0x28f   :  { %v1058_v9 = vadd.f32 %v1057_v34, %v969_v58  ;;  %v1360_v34 = vadd.f32 %v1359_v27, %v1329_v29 }
 0x291   :  { %v1107_v40 = vmax.f32 %v1058_v9, 0.0  ;;  %v1361_v1 = vadd.f32 %v1360_v34, %v1330_v0  ;;  %v2565_v9 = vld [vmem:[#allocation8_spill] sm:$0xff] }
 0x293   :  { %v1331_v3 = vmul.f32 %v1254_v48, %v1107_v40 }
 0x295   :  { %v1362_v5 = vadd.f32 %v1361_v1, %v1331_v3  ;;  %v1381_v1 = vstv %s2558_s6 }
 0x296   :  { %v1059_v38 = vpop.f32.mrf.mxu2 }
 0x297   :  { %v1060_v63 = vadd.f32 %v1059_v38, %v971_v6  ;;  %v981_v38 = vadd.f32 %v2485_v55, %v2437_v15  ;;  %v986_v15 = vadd.f32 %v2491_v39, %v2445_v24  ;;  %v1111_v55 = vmax.f32 %v1068_v31, 0.0  ;;  %v2563_v6 = vld [vmem:[#allocation7_spill] sm:$0xff] }
 0x298   :  { %v1078_v24 = vadd.f32 %v2516_v21, %v989_v33  ;;  %v1116_v21 = vmax.f32 %v1080_v8, 0.0 }
 0x299   :  { %v1108_v4 = vmax.f32 %v1060_v63, 0.0  ;;  %v1070_v14 = vadd.f32 %v2506_v12, %v981_v38  ;;  %v1075_v26 = vadd.f32 %v2510_v52, %v986_v15  ;;  %v1284_v12 = vpop.permute.xlu0 %1283  ;;  %v1335_v36 = vmul.f32 %v1274_v41, %v1111_v55  ;;  %v1294_v52 = vpop.permute.xlu2 %1293 }
 0x29a   :  { %v1115_v45 = vmax.f32 %v1078_v24, 0.0 }
 0x29b   :  { %v1332_v32 = vmul.f32 %v1259_v50, %v1108_v4  ;;  %v1112_v35 = vmax.f32 %v1070_v14, 0.0  ;;  %v1113_v50 = vmax.f32 %v1073_v59, 0.0  ;;  %v1114_v18 = vmax.f32 %v1075_v26, 0.0  ;;  %v1304_v4 = vpop.permute.xlu1 %1303 }
 0x29c   :  { %v1339_v29 = vmul.f32 %v1294_v52, %v1115_v45 }
 0x29d   :  { %v1363_v58 = vadd.f32 %v1362_v5, %v1332_v32  ;;  %v1336_v19 = vmul.f32 %v1279_v47, %v1112_v35  ;;  %v1337_v42 = vmul.f32 %v1284_v12, %v1113_v50  ;;  %v1338_v63 = vmul.f32 %v1289_v53, %v1114_v18 }
 0x29e   :  { %v1062_v37 = vpop.f32.mrf.mxu2 }
 0x29f   :  { %v1063_v30 = vadd.f32 %v1062_v37, %v974_v25  ;;  %v996_v25 = vadd.f32 %v2565_v9, %v2564_v46 }
 0x2a1   :  { %v1109_v13 = vmax.f32 %v1063_v30, 0.0  ;;  %v1085_v37 = vadd.f32 %v1084_v43, %v996_v25  ;;  %v1299_v30 = vpop.permute.xlu0 %1298  ;;  %v1309_v2 = vpop.permute.xlu2 %1308 }
 0x2a2   :  { %v1340_v27 = vmul.f32 %v1299_v30, %v1116_v21 }
 0x2a3   :  { %v1333_v11 = vmul.f32 %v1264_v28, %v1109_v13  ;;  %v994_v28 = vadd.f32 %v2563_v6, %v2452_v44  ;;  %v1118_v54 = vmax.f32 %v1085_v37, 0.0 }
 0x2a5   :  { %v1364_v56 = vadd.f32 %v1363_v58, %v1333_v11  ;;  %v1083_v57 = vadd.f32 %v1082_v62, %v994_v28  ;;  %v1342_v34 = vmul.f32 %v1309_v2, %v1118_v54 }
 0x2a6   :  { %v1064_v20 = vpop.f32.mrf.mxu2 }
 0x2a7   :  { %v1065_v48 = vadd.f32 %v1064_v20, %v976_v60  ;;  %v1117_v40 = vmax.f32 %v1083_v57, 0.0 }
 0x2a9   :  { %v1110_v17 = vmax.f32 %v1065_v48, 0.0 }
 0x2ab   :  { %v1334_v23 = vmul.f32 %v1269_v22, %v1110_v17  ;;  %v1341_v22 = vmul.f32 %v1304_v4, %v1117_v40 }
 0x2ad   :  { %v1365_v39 = vadd.f32 %v1364_v56, %v1334_v23 }
 0x2af   :  { %v1366_v16 = vadd.f32 %v1365_v39, %v1335_v36 }
 0x2b1   :  { %v1367_v49 = vadd.f32 %v1366_v16, %v1336_v19 }
 0x2b3   :  { %v1368_v51 = vadd.f32 %v1367_v49, %v1337_v42 }
 0x2b5   :  { %v1369_v44 = vadd.f32 %v1368_v51, %v1338_v63 }
 0x2b7   :  { %v1370_v0 = vadd.f32 %v1369_v44, %v1339_v29 }
 0x2b9   :  { %v1371_v61 = vadd.f32 %v1370_v0, %v1340_v27 }
 0x2bb   :  { %v1372_v3 = vadd.f32 %v1371_v61, %v1341_v22 }
 0x2bd   :  { %v1373_v13 = vadd.f32 %v1372_v3, %v1342_v34 }
 0x2bf   :  { %v1374_v41 = vrot.slane %v1373_v13, 4 }
 0x2c1   :  { %v1375_v38 = vadd.f32 %v1374_v41, %v1373_v13 }
 0x2c3   :  { %v1376_v47 = vrot.slane %v1375_v38, 2 }
 0x2c5   :  { %v1377_v31 = vadd.f32 %v1376_v47, %v1375_v38 }
 0x2c7   :  { %v1378_v60 = vrot.slane %v1377_v31, 1 }
 0x2c9   :  { %v1379_v32 = vadd.f32 %v1378_v60, %v1377_v31 }
 0x2cb   :  { %v1382_v10 = vadd.f32 %v1381_v1, %v1379_v32 }
 0x2cd   :  { %1383 = vst [vmem:[#allocation3] sm:$0x1] %v1382_v10 }
 0x2ce   :  { %1394 = dma.vmem_to_hbm [thread:$0]  %s1390_s22, 16, %s1392_s24, [#allocation4]  }
 0x2cf   :  { %1703 = dma.done.wait [#allocation4], 16  }
 0x2d0   :  { %1704 = vsyncadd [#allocation4], 4294967280 }
 0x2d1   :  { %1399 = vsyncpa [#allocation4], 1 }

</bundles_post_ra>
